<compile_context>
chip_gen: v6e
topology: v6e:2x2x1
jax: 0.10.0
libtpu: 0.0.40
codegen_flags: <defaults>
</compile_context>

<pallas_src>
import functools

import jax
import jax.numpy as jnp
from jax.experimental import pallas as pl
from jax.experimental.pallas import tpu as pltpu

BN_EPS = 1e-5


def _round_up(x, m):
    return (x + m - 1) // m * m


def _fc_kernel(x_ref, w1_ref, b1_ref, wh_ref, bh_ref, out_ref, h_ref):
    """Grid = (batch tiles i, fused-head column tiles j); j is innermost.

    x_ref:   [TB, Fp] f32   concatenated (features ++ user_emb), zero-padded
    w1_ref:  [Fp, Fp] bf16  fc_1 weight (in, out), zero-padded
    b1_ref:  [1, Fp]  f32   fc_1 bias, zero-padded
    wh_ref:  [Fp, TN] bf16  fused (fc_loc || fc_mode) weight, BN folded in
    bh_ref:  [1, TN]  f32   fused head bias, BN folded in
    out_ref: [TB, TN] f32   lane-dense fused head output
    h_ref:   [TB, Fp] f32   scratch: residual-block activations (reused over j)
    """
    j = pl.program_id(1)

    # Residual block is computed once per batch tile (j == 0) and reused for
    # every head-column tile.  Dropouts are identity in eval mode.
    @pl.when(j == 0)
    def _():
        x = x_ref[...]
        pre = jnp.dot(
            x.astype(jnp.bfloat16), w1_ref[...],
            preferred_element_type=jnp.float32,
        ) + b1_ref[...]
        h_ref[...] = x + jnp.maximum(pre, 0.0)

    # Fused (BN-folded) output head: one lane-dense matmul + unmasked store.
    h = h_ref[...].astype(jnp.bfloat16)
    out_ref[...] = jnp.dot(
        h, wh_ref[...], preferred_element_type=jnp.float32
    ) + bh_ref[...]


def prepare_params(params):
    """Offline prep: fold eval-mode BatchNorm into the heads, fuse loc/mode,
    pad to MXU-friendly shapes and cast matmul weights to bf16."""
    w1, b1 = params["w_1"], params["b_1"]
    F = w1.shape[0]
    L = params["w_loc"].shape[1]
    M = params["w_mode"].shape[1]

    # BN(h) = h * s + t  with  s = gamma / sqrt(var+eps),  t = beta - mean*s
    s = params["bn_gamma"] * jax.lax.rsqrt(params["bn_var"] + BN_EPS)   # [1, F]
    t = params["bn_beta"] - params["bn_mean"] * s                       # [1, F]

    # head(BN(h)) = h @ (diag(s) @ W) + (t @ W + b)
    w_loc_f = params["w_loc"] * s.reshape(F, 1)
    b_loc_f = params["b_loc"] + t @ params["w_loc"]
    w_mode_f = params["w_mode"] * s.reshape(F, 1)
    b_mode_f = params["b_mode"] + t @ params["w_mode"]

    w_head = jnp.concatenate([w_loc_f, w_mode_f], axis=1)   # [F, L+M]
    b_head = jnp.concatenate([b_loc_f, b_mode_f], axis=1)   # [1, L+M]

    Fp = _round_up(F, 128)
    N = L + M
    Np = _round_up(N, 128)
    if Np > 512:                       # keep head-column tiles of 512 exact
        Np = _round_up(N, 512)

    w1_p = jnp.zeros((Fp, Fp), jnp.float32).at[:F, :F].set(w1)
    b1_p = jnp.zeros((1, Fp), jnp.float32).at[:, :F].set(b1)
    wh_p = jnp.zeros((Fp, Np), jnp.float32).at[:F, :N].set(w_head)
    bh_p = jnp.zeros((1, Np), jnp.float32).at[:, :N].set(b_head)

    return {
        "emb_user": params["emb_user"],
        "w1": w1_p.astype(jnp.bfloat16),
        "b1": b1_p,
        "w_head": wh_p.astype(jnp.bfloat16),
        "b_head": bh_p,
    }


@functools.partial(jax.jit, static_argnames=("total_loc_num",))
def fully_connected_forward(out, user, prepared, *, total_loc_num):
    """out: [B, d_input] f32, user: [B] int32, prepared: dict from prepare_params."""
    # ---- glue (plain JAX): embedding gather + concat --------------------
    emb = prepared["emb_user"][user]                       # [B, user_emb_size]
    x = jnp.concatenate([out, emb], axis=-1).astype(jnp.float32)   # [B, F]
    B, F = x.shape
    Fp = prepared["w1"].shape[0]
    Np = prepared["w_head"].shape[1]
    L = total_loc_num

    # ---- tiling ----------------------------------------------------------
    TB = min(256, _round_up(B, 8))          # batch tile (sublane-aligned)
    Bp = _round_up(B, TB)
    TN = Np if Np <= 512 else 512           # head-column tile (lane-aligned)
    grid = (Bp // TB, Np // TN)

    x_p = jnp.zeros((Bp, Fp), jnp.float32).at[:B, :F].set(x)

    # VMEM budget (double-buffered inputs/outputs + scratch), with headroom.
    est_vmem = (
        2 * TB * Fp * 4        # x blocks (f32)
        + 2 * Fp * Fp * 2      # w1 (bf16)
        + 2 * Fp * 4           # b1
        + 2 * Fp * TN * 2      # w_head tile (bf16)
        + 2 * TN * 4           # b_head tile
        + 2 * TB * TN * 4      # output blocks
        + TB * Fp * 4          # h scratch
    )
    vmem_limit = int(min(100 * 2**20, max(32 * 2**20, 2 * est_vmem)))

    cost = pl.CostEstimate(
        flops=2 * Bp * Fp * (Fp + Np),
        transcendentals=0,
        bytes_accessed=(
            4 * Bp * Fp + 2 * Fp * Fp + 4 * Fp
            + 2 * Fp * Np + 4 * Np + 4 * Bp * Np
        ),
    )

    fused = pl.pallas_call(
        _fc_kernel,
        out_shape=jax.ShapeDtypeStruct((Bp, Np), jnp.float32),
        grid_spec=pltpu.PrefetchScalarGridSpec(
            num_scalar_prefetch=0,
            grid=grid,
            in_specs=[
                pl.BlockSpec((TB, Fp), lambda i, j: (i, 0)),   # x
                pl.BlockSpec((Fp, Fp), lambda i, j: (0, 0)),   # w1 (resident)
                pl.BlockSpec((1, Fp), lambda i, j: (0, 0)),    # b1 (resident)
                pl.BlockSpec((Fp, TN), lambda i, j: (0, j)),   # fused head W
                pl.BlockSpec((1, TN), lambda i, j: (0, j)),    # fused head b
            ],
            out_specs=pl.BlockSpec((TB, TN), lambda i, j: (i, j)),
            scratch_shapes=[pltpu.VMEM((TB, Fp), jnp.float32)],
        ),
        compiler_params=pltpu.CompilerParams(
            dimension_semantics=("parallel", "arbitrary"),
            vmem_limit_bytes=vmem_limit,
        ),
        cost_estimate=cost,
    )(x_p, prepared["w1"], prepared["b1"], prepared["w_head"], prepared["b_head"])

    loc = fused[:B, :L]
    mode = fused[:B, L:L + 8]
    return loc, mode


def init_params(key, d_input, user_emb_size, total_user_num, total_loc_num):
    fc_dim = d_input + user_emb_size
    ks = jax.random.split(key, 8)
    scale = lambda fan_in: 1.0 / jnp.sqrt(jnp.float32(fan_in))
    params = {
        "emb_user": jax.random.normal(ks[0], (total_user_num, user_emb_size), jnp.float32),
        # fc_1: Linear(fc_dim, fc_dim) -- stored as [in, out]
        "w_1": jax.random.normal(ks[1], (fc_dim, fc_dim), jnp.float32) * scale(fc_dim),
        "b_1": jax.random.normal(ks[2], (1, fc_dim), jnp.float32) * 0.01,
        # BatchNorm1d(fc_dim) -- eval-mode running stats
        "bn_gamma": 1.0 + 0.1 * jax.random.normal(ks[3], (1, fc_dim), jnp.float32),
        "bn_beta": 0.1 * jax.random.normal(ks[4], (1, fc_dim), jnp.float32),
        "bn_mean": 0.05 * jax.random.normal(ks[5], (1, fc_dim), jnp.float32),
        "bn_var": jnp.ones((1, fc_dim), jnp.float32),
        # fc_loc: Linear(fc_dim, total_loc_num)
        "w_loc": jax.random.normal(ks[6], (fc_dim, total_loc_num), jnp.float32) * scale(fc_dim),
        "b_loc": jnp.zeros((1, total_loc_num), jnp.float32),
        # fc_mode: Linear(fc_dim, 8)
        "w_mode": jax.random.normal(ks[7], (fc_dim, 8), jnp.float32) * scale(fc_dim),
        "b_mode": jnp.zeros((1, 8), jnp.float32),
    }
    return params


if __name__ == "__main__":
    # Small config consistent with the module.
    B = 8
    d_input = 32
    user_emb_size = 16        # fc_dim = 48 (padded to 128 inside the wrapper)
    total_user_num = 16
    total_loc_num = 128

    key = jax.random.PRNGKey(0)
    k_in, k_user, k_par = jax.random.split(key, 3)

    out = jax.random.normal(k_in, (B, d_input), jnp.float32)
    user = jax.random.randint(k_user, (B,), 0, total_user_num, jnp.int32)
    params = init_params(k_par, d_input, user_emb_size, total_user_num, total_loc_num)

    prepared = prepare_params(params)
    loc_logits, mode_logits = fully_connected_forward(
        out, user, prepared, total_loc_num=total_loc_num)
    jax.block_until_ready((loc_logits, mode_logits))

    assert loc_logits.shape == (B, total_loc_num) and mode_logits.shape == (B, 8)

    # ---- reference 1: mirrors the kernel's prepared params + bf16 casts (tight) ----
    emb = params["emb_user"][user]
    x = jnp.concatenate([out, emb], axis=-1)
    F = x.shape[1]
    Fp = prepared["w1"].shape[0]
    x_p = jnp.zeros((B, Fp), jnp.float32).at[:, :F].set(x)
    pre = (x_p.astype(jnp.bfloat16).astype(jnp.float32)
           @ prepared["w1"].astype(jnp.float32)) + prepared["b1"]
    h = x_p + jnp.maximum(pre, 0.0)
    head = (h.astype(jnp.bfloat16).astype(jnp.float32)
            @ prepared["w_head"].astype(jnp.float32)) + prepared["b_head"]
    ref_loc_t = head[:, :total_loc_num]
    ref_mode_t = head[:, total_loc_num:total_loc_num + 8]
    assert jnp.allclose(loc_logits, ref_loc_t, atol=2e-3, rtol=2e-3)
    assert jnp.allclose(mode_logits, ref_mode_t, atol=2e-3, rtol=2e-3)

    # ---- reference 2: original module semantics in f32 (loose, bf16 drift bound) ----
    h_f = x + jnp.maximum(x @ params["w_1"] + params["b_1"], 0.0)
    h_bn = ((h_f - params["bn_mean"])
            * jax.lax.rsqrt(params["bn_var"] + BN_EPS)
            * params["bn_gamma"] + params["bn_beta"])
    ref_loc = h_bn @ params["w_loc"] + params["b_loc"]
    ref_mode = h_bn @ params["w_mode"] + params["b_mode"]
    assert float(jnp.max(jnp.abs(loc_logits - ref_loc))) < 0.25
    assert float(jnp.max(jnp.abs(mode_logits - ref_mode))) < 0.25

    print("KERNEL_OK")
</pallas_src>

<mosaic_0001>
module attributes {stable_mosaic.version = 11 : i64} {
  func.func @_fc_kernel(%arg0: i32, %arg1: i32, %arg2: memref<8x128xf32, #tpu.memory_space<vmem>>, %arg3: memref<128x128xbf16, #tpu.memory_space<vmem>>, %arg4: memref<1x128xf32, #tpu.memory_space<vmem>>, %arg5: memref<128x256xbf16, #tpu.memory_space<vmem>>, %arg6: memref<1x256xf32, #tpu.memory_space<vmem>>, %arg7: memref<8x256xf32, #tpu.memory_space<vmem>>, %arg8: memref<8x128xf32, #tpu.memory_space<vmem>>) attributes {dimension_semantics = [#tpu.dimension_semantics<parallel>, #tpu.dimension_semantics<arbitrary>], iteration_bounds = array<i64: 1, 1>, scalar_prefetch = 0 : i64, scratch_operands = 1 : i64, tpu.core_type = #tpu.core_type<tc>, window_params = [{transform_indices = @transform_0, window_bounds = array<i64: 8, 128>}, {pipeline_mode = #tpu.pipeline_mode<synchronous>, transform_indices = @transform_1, window_bounds = array<i64: 128, 128>}, {pipeline_mode = #tpu.pipeline_mode<synchronous>, transform_indices = @transform_2, window_bounds = array<i64: 1, 128>}, {transform_indices = @transform_3, window_bounds = array<i64: 128, 256>}, {transform_indices = @transform_4, window_bounds = array<i64: 1, 256>}, {transform_indices = @transform_5, window_bounds = array<i64: 8, 256>}]} {
    %c0_i32 = arith.constant 0 : i32
    %0 = arith.cmpi eq, %arg1, %c0_i32 : i32
    %1 = arith.extui %0 : i1 to i32
    %c0_i32_0 = arith.constant 0 : i32
    %2 = arith.cmpi ne, %1, %c0_i32_0 : i32
    scf.if %2 {
      %c0_8 = arith.constant 0 : index
      %c0_9 = arith.constant 0 : index
      %11 = vector.load %arg2[%c0_8, %c0_9] : memref<8x128xf32, #tpu.memory_space<vmem>>, vector<8x128xf32>
      %12 = arith.truncf %11 : vector<8x128xf32> to vector<8x128xbf16>
      %c0_10 = arith.constant 0 : index
      %c0_11 = arith.constant 0 : index
      %13 = vector.load %arg3[%c0_10, %c0_11] : memref<128x128xbf16, #tpu.memory_space<vmem>>, vector<128x128xbf16>
      %cst_12 = arith.constant dense<0.000000e+00> : vector<8x128xf32>
      %14 = tpu.matmul %12, %13, %cst_12 {dimension_numbers = #tpu.dot_dimension_numbers<[1], [0], [0], [1], [0, 0, 1, 1], [], []>} : vector<8x128xbf16>, vector<128x128xbf16>, vector<8x128xf32> -> vector<8x128xf32>
      %c0_13 = arith.constant 0 : index
      %c0_14 = arith.constant 0 : index
      %15 = vector.load %arg4[%c0_13, %c0_14] : memref<1x128xf32, #tpu.memory_space<vmem>>, vector<1x128xf32>
      %16 = vector.broadcast %15 : vector<1x128xf32> to vector<8x128xf32>
      %17 = arith.addf %14, %16 : vector<8x128xf32>
      %cst_15 = arith.constant 0.000000e+00 : f32
      %18 = vector.broadcast %cst_15 : f32 to vector<8x128xf32>
      %19 = arith.maximumf %17, %18 : vector<8x128xf32>
      %20 = arith.addf %11, %19 : vector<8x128xf32>
      %c0_16 = arith.constant 0 : index
      %c0_17 = arith.constant 0 : index
      %21 = vector.load %arg8[%c0_16, %c0_17] : memref<8x128xf32, #tpu.memory_space<vmem>>, vector<8x128xf32>
      tpu.vector_store %arg8[%c0_16, %c0_17], %20 {strides = array<i32>} : memref<8x128xf32, #tpu.memory_space<vmem>>, vector<8x128xf32>,
    } else {
    }
    %c0 = arith.constant 0 : index
    %c0_1 = arith.constant 0 : index
    %3 = vector.load %arg8[%c0, %c0_1] : memref<8x128xf32, #tpu.memory_space<vmem>>, vector<8x128xf32>
    %4 = arith.truncf %3 : vector<8x128xf32> to vector<8x128xbf16>
    %c0_2 = arith.constant 0 : index
    %c0_3 = arith.constant 0 : index
    %5 = vector.load %arg5[%c0_2, %c0_3] : memref<128x256xbf16, #tpu.memory_space<vmem>>, vector<128x256xbf16>
    %cst = arith.constant dense<0.000000e+00> : vector<8x256xf32>
    %6 = tpu.matmul %4, %5, %cst {dimension_numbers = #tpu.dot_dimension_numbers<[1], [0], [0], [1], [0, 0, 1, 1], [], []>} : vector<8x128xbf16>, vector<128x256xbf16>, vector<8x256xf32> -> vector<8x256xf32>
    %c0_4 = arith.constant 0 : index
    %c0_5 = arith.constant 0 : index
    %7 = vector.load %arg6[%c0_4, %c0_5] : memref<1x256xf32, #tpu.memory_space<vmem>>, vector<1x256xf32>
    %8 = vector.broadcast %7 : vector<1x256xf32> to vector<8x256xf32>
    %9 = arith.addf %6, %8 : vector<8x256xf32>
    %c0_6 = arith.constant 0 : index
    %c0_7 = arith.constant 0 : index
    %10 = vector.load %arg7[%c0_6, %c0_7] : memref<8x256xf32, #tpu.memory_space<vmem>>, vector<8x256xf32>
    tpu.vector_store %arg7[%c0_6, %c0_7], %9 {strides = array<i32>} : memref<8x256xf32, #tpu.memory_space<vmem>>, vector<8x256xf32>,
    return
  }
  func.func @transform_0(%arg0: i32, %arg1: i32) -> (i32, i32) {
    %c0_i32 = arith.constant 0 : i32
    %c0_i32_0 = arith.constant 0 : i32
    return %arg0, %c0_i32 : i32, i32
  }
  func.func @transform_1(%arg0: i32, %arg1: i32) -> (i32, i32) {
    %c0_i32 = arith.constant 0 : i32
    %c0_i32_0 = arith.constant 0 : i32
    %c0_i32_1 = arith.constant 0 : i32
    return %c0_i32, %c0_i32_0 : i32, i32
  }
  func.func @transform_2(%arg0: i32, %arg1: i32) -> (i32, i32) {
    %c0_i32 = arith.constant 0 : i32
    %c0_i32_0 = arith.constant 0 : i32
    %c0_i32_1 = arith.constant 0 : i32
    return %c0_i32, %c0_i32_0 : i32, i32
  }
  func.func @transform_3(%arg0: i32, %arg1: i32) -> (i32, i32) {
    %c0_i32 = arith.constant 0 : i32
    %c0_i32_0 = arith.constant 0 : i32
    return %c0_i32, %arg1 : i32, i32
  }
  func.func @transform_4(%arg0: i32, %arg1: i32) -> (i32, i32) {
    %c0_i32 = arith.constant 0 : i32
    %c0_i32_0 = arith.constant 0 : i32
    return %c0_i32, %arg1 : i32, i32
  }
  func.func @transform_5(%arg0: i32, %arg1: i32) -> (i32, i32) {
    %c0_i32 = arith.constant 0 : i32
    return %arg0, %arg1 : i32, i32
  }
}

</mosaic_0001>

<bundles_post_ra>
// kernel: fully_connected_forward.1
= control target key start
LH: loop header
LB: loop body
LE: loop exit
PB: predicated region body
PF: predicated region fallthrough
CT: control target
= control target key end

     0   :  { %10 = vsyncpa [#allocation4], 0  ;;  %s427_s18 = smov [#allocation3]   ;;  %s529_s0 = inlined_call_operand.vmem [shape: f32[8,128], index: 0, kind: input, shape index: {}]   ;;  %s530_s1 = inlined_call_operand.hbm [shape: bf16[128,128], index: 1, kind: input, shape index: {}]   ;;  %s531_s2 = inlined_call_operand.vmem [shape: f32[1,128], index: 2, kind: input, shape index: {}]   ;;  %s532_s3 = inlined_call_operand.vmem [shape: bf16[128,256], index: 3, kind: input, shape index: {}]   ;;  %s533_s4 = inlined_call_operand.vmem [shape: f32[1,256], index: 4, kind: input, shape index: {}]   ;;  %s534_s5 = inlined_call_operand.vmem [shape: f32[8,256], index: 5, kind: output, shape index: {}]  }
   0x1   :  { %s18_s19 = sshll.u32 %s427_s18, 4  ;;  %s19_s19 = int_to_ptr.vmem [resolvable:$true] %s18_s19 }
   0x2   :  { %s413_s20 = scalar_lea.vmem %s19_s19, 1024  ;;  %p418_p1 = scmp.lt.s32.totalorder %s19_s19, %s19_s19 }
   0x3   :  { %p414_p0 = scmp.ne.s32.totalorder %s19_s19, %s413_s20  ;;  %p419_p2 = scmp.lt.s32.totalorder %s413_s20, %s413_s20 }
   0x5   :  { %p420_p3 = por %p419_p2, %p418_p1 }
   0x7   :  { %p421_p4 = pnand %p420_p3, %p414_p0 }
   0x9   :  { %424 = shalt.err (!%p421_p4)
}
   0xa   :  { %s428_s21 = smov 64   ;;  %s429_s22 = smov 4  }
   0xb   :  { %24 = dma.hbm_to_vmem [thread:$0]  %s530_s1, 1024, %s19_s19, [#allocation4], %s428_s21, %s428_s21, %s429_s22  }
   0xc   :  { %425 = dma.done.wait [#allocation4], 1024  }
   0xd   :  { %426 = vsyncadd [#allocation4], 4294966272  ;;  %v430_v0 = vmov 0.0   ;;  %vm431_vm0 = vmmov 0   ;;  %v373_v1 = vld [vmem:[#allocation3 + $0x38] sm:$0xff]   ;;  %v374_v2 = vld [vmem:[#allocation3 + $0x30] sm:$0xff]   ;;  %v175_v37 = vlaneseq }
   0xe   :  { %347 = vmatprep.subr.bf16.mxu0 %v430_v0  ;;  %363 = vmatprep.mubr.msk.bf16.mxu0 %vm431_vm0, %v430_v0  ;;  %v375_v3 = vld [vmem:[#allocation3 + $0x28] sm:$0xff]   ;;  %v381_v4 = vld [vmem:[%s532_s3 + $0x74] ss:$8 sps:$4 sm:$0xff]   ;;  %v383_v5 = vld [vmem:[%s532_s3 + $0x70] ss:$8 sps:$4 sm:$0xff]   ;;  %v432_v27 = vmov 0  }
   0xf   :  { %348 = vmatpush3.bf16.msra.mxu0 %v373_v1  ;;  %v376_v6 = vld [vmem:[#allocation3 + $0x20] sm:$0xff]   ;;  %265 = vmatprep.subr.bf16.mxu1 %v381_v4  ;;  %v387_v9 = vld [vmem:[%s532_s3 + $0x54] ss:$8 sps:$4 sm:$0xff]   ;;  %v389_v11 = vld [vmem:[%s532_s3 + $0x50] ss:$8 sps:$4 sm:$0xff]   ;;  %v176_v38 = vshrl.u32 %v175_v37, 7 }
  0x10   :  { %349 = vmatprep.subr.bf16.mxu0 %v430_v0  ;;  %v384_v7 = vld [vmem:[%s532_s3 + $0x64] ss:$8 sps:$4 sm:$0xff]   ;;  %266 = vmatpush1.bf16.msra.mxu1 %v383_v5  ;;  %v386_v8 = vld [vmem:[%s532_s3 + $0x60] ss:$8 sps:$4 sm:$0xff]   ;;  %v377_v10 = vld [vmem:[#allocation3 + $0x18] sm:$0xff]  }
  0x11   :  { %267 = vmatprep.subr.bf16.mxu1 %v384_v7  ;;  %v390_v12 = vld [vmem:[%s532_s3 + $0x44] ss:$8 sps:$4 sm:$0xff]   ;;  %v378_v13 = vld [vmem:[#allocation3 + $0x10] sm:$0xff]   ;;  %v392_v14 = vld [vmem:[%s532_s3 + $0x40] ss:$8 sps:$4 sm:$0xff]   ;;  %297 = vmatprep.mubr.bf16.mxu1 %v432_v27  ;;  %v177_v39 = vsub.s32 0, %v176_v38 }
  0x12   :  { %v393_v15 = vld [vmem:[%s532_s3 + $0x34] ss:$8 sps:$4 sm:$0xff]   ;;  %v379_v16 = vld [vmem:[#allocation3 + $0x8] sm:$0xff]   ;;  %v395_v17 = vld [vmem:[%s532_s3 + $0x30] ss:$8 sps:$4 sm:$0xff]   ;;  %v181_v41 = vsub.s32 1, %v176_v38 }
  0x13   :  { %350 = vmatpush3.bf16.msra.mxu0 %v374_v2  ;;  %v396_v18 = vld [vmem:[%s532_s3 + $0x24] ss:$8 sps:$4 sm:$0xff]   ;;  %v398_v21 = vld [vmem:[%s532_s3 + $0x20] ss:$8 sps:$4 sm:$0xff]   ;;  %v399_v23 = vld [vmem:[%s532_s3 + $0x14] ss:$8 sps:$4 sm:$0xff]  }
  0x14   :  { %351 = vmatprep.subr.bf16.mxu0 %v430_v0  ;;  %268 = vmatpush1.bf16.msra.mxu1 %v386_v8  ;;  %v380_v19 = vld [vmem:[#allocation3] sm:$0xff]   ;;  %v401_v24 = vld [vmem:[%s532_s3 + $0x10] ss:$8 sps:$4 sm:$0xff]  }
  0x15   :  { %269 = vmatprep.subr.bf16.mxu1 %v387_v9  ;;  %v39_v20 = vld [vmem:[%s529_s0] sm:$0xff] }
  0x16   :  { %v40_v22 = vpack.c.bf16 %v39_v20, %v39_v20  ;;  %v402_v25 = vld [vmem:[%s532_s3 + $0x4] ss:$8 sps:$4 sm:$0xff]   ;;  %v404_v26 = vld [vmem:[%s532_s3] ss:$8 sps:$4 sm:$0xff]  }
  0x17   :  { %352 = vmatpush3.bf16.msra.mxu0 %v375_v3  ;;  %v313_v28 = vld [vmem:[%s531_s2] ss:$0 sm:$0xff] }
  0x18   :  { %353 = vmatprep.subr.bf16.mxu0 %v430_v0  ;;  %270 = vmatpush1.bf16.msra.mxu1 %v389_v11  ;;  %v173_v40 = vld [vmem:[%s533_s4] sm:$0x3] }
  0x19   :  { %271 = vmatprep.subr.bf16.mxu1 %v390_v12  ;;  %v178_v42 = vrot.slane %v173_v40, %v177_v39  ;;  %v182_v43 = vrot.slane %v173_v40, %v181_v41 }
  0x1b   :  { %354 = vmatpush3.bf16.msra.mxu0 %v376_v6 }
  0x1c   :  { %355 = vmatprep.subr.bf16.mxu0 %v430_v0  ;;  %272 = vmatpush1.bf16.msra.mxu1 %v392_v14 }
  0x1d   :  { %273 = vmatprep.subr.bf16.mxu1 %v393_v15 }
  0x1f   :  { %356 = vmatpush3.bf16.msra.mxu0 %v377_v10 }
  0x20   :  { %357 = vmatprep.subr.bf16.mxu0 %v430_v0  ;;  %274 = vmatpush1.bf16.msra.mxu1 %v395_v17 }
  0x21   :  { %275 = vmatprep.subr.bf16.mxu1 %v396_v18 }
  0x23   :  { %358 = vmatpush3.bf16.msra.mxu0 %v378_v13 }
  0x24   :  { %359 = vmatprep.subr.bf16.mxu0 %v430_v0  ;;  %276 = vmatpush1.bf16.msra.mxu1 %v398_v21 }
  0x25   :  { %277 = vmatprep.subr.bf16.mxu1 %v399_v23 }
  0x27   :  { %360 = vmatpush3.bf16.msra.mxu0 %v379_v16 }
  0x28   :  { %361 = vmatprep.subr.bf16.mxu0 %v430_v0  ;;  %278 = vmatpush1.bf16.msra.mxu1 %v401_v24 }
  0x29   :  { %279 = vmatprep.subr.bf16.mxu1 %v402_v25 }
  0x2b   :  { %362 = vmatpush3.bf16.msra.mxu0 %v380_v19 }
  0x2c   :  { %280 = vmatpush1.bf16.msra.mxu1 %v404_v26 }
  0x2e   :  { %364 = vmatmul.mubr.bf16.vlgmr.msra.gmra.mxu0 %v40_v22 }
  0xee   :  { %v146_v29 = vpop.f32.mrf.mxu0 }
  0xef   :  { %v147_v30 = vadd.f32 %v313_v28, %v146_v29 }
  0xf0   :  { %v365_v31 = vpop.f32.mrf.mxu0 }
  0xf1   :  { %v152_v32 = vmax.f32 %v147_v30, 0.0 }
  0xf2   :  { %v149_v33 = vpop.f32.mrf.mxu0 }
  0xf3   :  { %v153_v34 = vadd.f32 %v152_v32, %v39_v20 }
  0xf4   :  { %v366_v35 = vpop.f32.mrf.mxu0 }
  0xf5   :  { %v156_v36 = vpack.c.bf16 %v153_v34, %v153_v34 }
  0xf7   :  { %298 = vmatmul.mubr.bf16.vlgmr.msra.gmra.mxu1 %v156_v36 }
 0x1b7   :  { %v299_v44 = vpop.f32.mrf.mxu1 }
 0x1b8   :  { %v300_v45 = vadd.f32 %v299_v44, %v178_v42 }
 0x1b9   :  { %v301_v46 = vpop.f32.mrf.mxu1 }
 0x1ba   :  { %306 = vst [vmem:[%s534_s5] sm:$0xff] %v300_v45  ;;  %v302_v47 = vadd.f32 %v301_v46, %v182_v43 }
 0x1bb   :  { %v303_v48 = vpop.f32.mrf.mxu1 }
 0x1bc   :  { %307 = vst [vmem:[%s534_s5 + $0x8] sm:$0xff] %v302_v47 }
 0x1bd   :  { %v304_v49 = vpop.f32.mrf.mxu1 }
 0x1be   :  { %312 = vsyncpa [#allocation4], 1 }

</bundles_post_ra>
